<compile_context>
chip_gen: v5e
topology: v5e:2x2
jax: 0.10.0
libtpu: 0.0.40
codegen_flags: <defaults>
</compile_context>

<pallas_src>
import jax
import jax.numpy as jnp
from jax.experimental import pallas as pl
from jax.experimental.pallas import tpu as pltpu

_BIG_NEG = -1e30  # finite "minus infinity": avoids inf/NaN in the online rescale


def _round_up(a, m):
    return ((a + m - 1) // m) * m


def _sublane_multiple(dtype):
    # f32 -> 8, bf16 -> 16, int8/fp8 -> 32 (sub-32-bit dtypes pack along sublanes)
    return max(8, 32 // jnp.dtype(dtype).itemsize)


def _make_kernel(batch, num_classes):
    def kernel(x_ref, lab_ref, out_ref, m_sc, s_sc, p_sc):
        i = pl.program_id(0)          # batch-tile index  ("parallel")
        k = pl.program_id(1)          # class-tile index  ("arbitrary", reduction)
        nk = pl.num_programs(1)
        tb, tk = x_ref.shape

        @pl.when(k == 0)
        def _init():
            m_sc[...] = jnp.full(m_sc.shape, _BIG_NEG, dtype=jnp.float32)
            s_sc[...] = jnp.zeros_like(s_sc)
            p_sc[...] = jnp.zeros_like(p_sc)

        # Native-dtype DMA, f32 compute.
        x = x_ref[...].astype(jnp.float32)          # (TB, TK)
        labels = lab_ref[...]                       # (TB, 1) int32

        # Global class ids for this K tile; mask padded columns.
        col = jax.lax.broadcasted_iota(jnp.int32, (tb, tk), 1) + k * tk
        x_m = jnp.where(col < num_classes, x, _BIG_NEG)

        # Online (streaming) logsumexp update.
        m_prev = m_sc[...]
        m_new = jnp.maximum(m_prev, jnp.max(x_m, axis=-1, keepdims=True))
        alpha = jnp.exp(m_prev - m_new)
        s_sc[...] = s_sc[...] * alpha + jnp.sum(
            jnp.exp(x_m - m_new), axis=-1, keepdims=True)
        m_sc[...] = m_new

        # Picked (target-class) logit: only the tile containing label[i]
        # contributes; gather done as a masked lane reduction (VPU/XLU only).
        p_sc[...] = p_sc[...] + jnp.sum(
            jnp.where(col == labels, x, 0.0), axis=-1, keepdims=True)

        @pl.when(k == nk - 1)
        def _finalize():
            lse = jnp.log(s_sc[...]) + m_sc[...]             # (TB, 1)
            per_row = lse - p_sc[...]                        # (TB, 1)
            row = jax.lax.broadcasted_iota(jnp.int32, per_row.shape, 0) + i * tb
            out_ref[...] = jnp.where(row < batch, per_row, 0.0)

    return kernel


def nce_softmax_loss(x, label, *, block_b=None, block_k=None):
    """x: anything that squeezes to (B, K) logits (any float dtype);
    label: (B,) integer class ids. Returns scalar f32 mean cross-entropy."""
    x = jnp.squeeze(x)                     # mirror torch's x.squeeze()
    label = jnp.asarray(label)
    if x.ndim == 1:                        # (1, K, 1) squeezes to (K,): batch of 1
        x = x[None, :]
        label = label.reshape(1)
    assert x.ndim == 2, "expected logits to squeeze to (batch, num_classes)"
    b, k = x.shape
    label2d = label.astype(jnp.int32).reshape(b, 1)

    # Tile sizes: sublane-aligned batch tile, lane-aligned class tile.
    sub = _sublane_multiple(x.dtype)
    tb = block_b if block_b is not None else 512
    tk = block_k if block_k is not None else 2048
    tb = _round_up(min(tb, _round_up(b, sub)), sub)
    tk = _round_up(min(tk, _round_up(k, 128)), 128)

    nb = pl.cdiv(b, tb)
    nk = pl.cdiv(k, tk)

    per_row = pl.pallas_call(
        _make_kernel(b, k),
        out_shape=jax.ShapeDtypeStruct((nb * tb, 1), jnp.float32),
        grid_spec=pltpu.PrefetchScalarGridSpec(
            num_scalar_prefetch=0,
            grid=(nb, nk),                                   # reduction axis last
            in_specs=[
                pl.BlockSpec((tb, tk), lambda i, j: (i, j)),  # logits (native dtype)
                pl.BlockSpec((tb, 1), lambda i, j: (i, 0)),   # labels
            ],
            out_specs=pl.BlockSpec((tb, 1), lambda i, j: (i, 0)),
            scratch_shapes=[pltpu.VMEM((tb, 1), jnp.float32)] * 3,  # m, s, picked
        ),
        compiler_params=pltpu.CompilerParams(
            dimension_semantics=("parallel", "arbitrary"),
            vmem_limit_bytes=32 * 1024 * 1024,   # explicit budget (fits v7x 64 MiB)
        ),
    )(x, label2d)

    # Padded rows are exact zeros; divide by the GLOBAL batch size.
    return jnp.sum(per_row) / jnp.float32(b)


def _reference_loss(x, label):
    x = jnp.squeeze(x).astype(jnp.float32)
    if x.ndim == 1:
        x = x[None, :]
        label = jnp.asarray(label).reshape(1)
    logp = jax.nn.log_softmax(x, axis=-1)
    return -jnp.mean(logp[jnp.arange(x.shape[0]), label])


if __name__ == "__main__":
    key = jax.random.PRNGKey(0)
    kx, kl = jax.random.split(key)

    # Non-multiples of (8, 128) to exercise edge-block masking; typical NCE
    # usage passes logits of shape (B, K, 1) and squeeze handles it.
    B, K = 20, 300
    x = jax.random.normal(kx, (B, K, 1), dtype=jnp.float32)
    label = jax.random.randint(kl, (B,), 0, K, dtype=jnp.int32)

    # Small explicit tiles -> multi-tile grid (3 x 3) with streaming logsumexp.
    loss = nce_softmax_loss(x, label, block_b=8, block_k=128)
    jax.block_until_ready(loss)
    ref = _reference_loss(x, label)
    assert jnp.allclose(loss, ref, atol=1e-5, rtol=1e-5), (loss, ref)

    # bf16 logits: DMA'd in bf16 (half the HBM traffic), f32 math in-kernel.
    xb = x.astype(jnp.bfloat16)
    loss_bf16 = nce_softmax_loss(xb, label)   # auto tile sizes
    jax.block_until_ready(loss_bf16)
    ref_bf16 = _reference_loss(xb, label)
    assert jnp.allclose(loss_bf16, ref_bf16, atol=1e-4, rtol=1e-4), (loss_bf16, ref_bf16)

    print("KERNEL_OK")
</pallas_src>

<mosaic_0001>
module attributes {stable_mosaic.version = 11 : i64} {
  func.func @kernel(%arg0: i32, %arg1: i32, %arg2: memref<8x128xf32, #tpu.memory_space<vmem>>, %arg3: memref<8x1xi32, #tpu.memory_space<vmem>>, %arg4: memref<8x1xf32, #tpu.memory_space<vmem>>, %arg5: memref<8x1xf32, #tpu.memory_space<vmem>>, %arg6: memref<8x1xf32, #tpu.memory_space<vmem>>, %arg7: memref<8x1xf32, #tpu.memory_space<vmem>>) attributes {dimension_semantics = [#tpu.dimension_semantics<parallel>, #tpu.dimension_semantics<arbitrary>], iteration_bounds = array<i64: 3, 3>, scalar_prefetch = 0 : i64, scratch_operands = 3 : i64, tpu.core_type = #tpu.core_type<tc>, window_params = [{transform_indices = @transform_0, window_bounds = array<i64: 8, 128>}, {transform_indices = @transform_1, window_bounds = array<i64: 8, 1>}, {transform_indices = @transform_2, window_bounds = array<i64: 8, 1>}]} {
    %c0_i32 = arith.constant 0 : i32
    %0 = arith.cmpi eq, %arg1, %c0_i32 : i32
    %1 = arith.extui %0 : i1 to i32
    %c0_i32_0 = arith.constant 0 : i32
    %2 = arith.cmpi ne, %1, %c0_i32_0 : i32
    scf.if %2 {
      %cst_21 = arith.constant -1.000000e+30 : f32
      %41 = vector.broadcast %cst_21 : f32 to vector<8x1xf32>
      %c0_22 = arith.constant 0 : index
      %c0_23 = arith.constant 0 : index
      %42 = vector.load %arg5[%c0_22, %c0_23] : memref<8x1xf32, #tpu.memory_space<vmem>>, vector<8x1xf32>
      tpu.vector_store %arg5[%c0_22, %c0_23], %41 {strides = array<i32>} : memref<8x1xf32, #tpu.memory_space<vmem>>, vector<8x1xf32>,
      %cst_24 = arith.constant 0.000000e+00 : f32
      %43 = vector.broadcast %cst_24 : f32 to vector<8x1xf32>
      %c0_25 = arith.constant 0 : index
      %c0_26 = arith.constant 0 : index
      %44 = vector.load %arg6[%c0_25, %c0_26] : memref<8x1xf32, #tpu.memory_space<vmem>>, vector<8x1xf32>
      tpu.vector_store %arg6[%c0_25, %c0_26], %43 {strides = array<i32>} : memref<8x1xf32, #tpu.memory_space<vmem>>, vector<8x1xf32>,
      %cst_27 = arith.constant 0.000000e+00 : f32
      %45 = vector.broadcast %cst_27 : f32 to vector<8x1xf32>
      %c0_28 = arith.constant 0 : index
      %c0_29 = arith.constant 0 : index
      %46 = vector.load %arg7[%c0_28, %c0_29] : memref<8x1xf32, #tpu.memory_space<vmem>>, vector<8x1xf32>
      tpu.vector_store %arg7[%c0_28, %c0_29], %45 {strides = array<i32>} : memref<8x1xf32, #tpu.memory_space<vmem>>, vector<8x1xf32>,
    } else {
    }
    %c0 = arith.constant 0 : index
    %c0_1 = arith.constant 0 : index
    %3 = vector.load %arg2[%c0, %c0_1] : memref<8x128xf32, #tpu.memory_space<vmem>>, vector<8x128xf32>
    %c0_2 = arith.constant 0 : index
    %c0_3 = arith.constant 0 : index
    %4 = vector.load %arg3[%c0_2, %c0_3] : memref<8x1xi32, #tpu.memory_space<vmem>>, vector<8x1xi32>
    %5 = tpu.iota {dimensions = array<i32: 1>} : vector<8x128xi32>
    %c128_i32 = arith.constant 128 : i32
    %6 = arith.muli %arg1, %c128_i32 : i32
    %7 = vector.broadcast %6 : i32 to vector<8x128xi32>
    %8 = arith.addi %5, %7 : vector<8x128xi32>
    %c300_i32 = arith.constant 300 : i32
    %9 = vector.broadcast %c300_i32 : i32 to vector<8x128xi32>
    %10 = arith.cmpi slt, %8, %9 : vector<8x128xi32>
    %cst = arith.constant -1.000000e+30 : f32
    %11 = vector.broadcast %cst : f32 to vector<8x128xf32>
    %12 = arith.select %10, %3, %11 : vector<8x128xi1>, vector<8x128xf32>
    %c0_4 = arith.constant 0 : index
    %c0_5 = arith.constant 0 : index
    %13 = vector.load %arg5[%c0_4, %c0_5] : memref<8x1xf32, #tpu.memory_space<vmem>>, vector<8x1xf32>
    %cst_6 = arith.constant dense<0xFF800000> : vector<8xf32>
    %14 = vector.multi_reduction <maximumf>, %12, %cst_6 [1] : vector<8x128xf32> to vector<8xf32>
    %15 = vector.shape_cast %14 : vector<8xf32> to vector<8x1xf32>
    %16 = arith.maximumf %13, %15 : vector<8x1xf32>
    %17 = arith.subf %13, %16 : vector<8x1xf32>
    %18 = math.exp %17 : vector<8x1xf32>
    %c0_7 = arith.constant 0 : index
    %c0_8 = arith.constant 0 : index
    %19 = vector.load %arg6[%c0_7, %c0_8] : memref<8x1xf32, #tpu.memory_space<vmem>>, vector<8x1xf32>
    %20 = arith.mulf %19, %18 : vector<8x1xf32>
    %21 = vector.broadcast %16 : vector<8x1xf32> to vector<8x128xf32>
    %22 = arith.subf %12, %21 : vector<8x128xf32>
    %23 = math.exp %22 : vector<8x128xf32>
    %cst_9 = arith.constant dense<0.000000e+00> : vector<8xf32>
    %24 = vector.multi_reduction <add>, %23, %cst_9 [1] : vector<8x128xf32> to vector<8xf32>
    %25 = vector.shape_cast %24 : vector<8xf32> to vector<8x1xf32>
    %26 = arith.addf %20, %25 : vector<8x1xf32>
    %c0_10 = arith.constant 0 : index
    %c0_11 = arith.constant 0 : index
    %27 = vector.load %arg6[%c0_10, %c0_11] : memref<8x1xf32, #tpu.memory_space<vmem>>, vector<8x1xf32>
    tpu.vector_store %arg6[%c0_10, %c0_11], %26 {strides = array<i32>} : memref<8x1xf32, #tpu.memory_space<vmem>>, vector<8x1xf32>,
    %c0_12 = arith.constant 0 : index
    %c0_13 = arith.constant 0 : index
    %28 = vector.load %arg5[%c0_12, %c0_13] : memref<8x1xf32, #tpu.memory_space<vmem>>, vector<8x1xf32>
    tpu.vector_store %arg5[%c0_12, %c0_13], %16 {strides = array<i32>} : memref<8x1xf32, #tpu.memory_space<vmem>>, vector<8x1xf32>,
    %c0_14 = arith.constant 0 : index
    %c0_15 = arith.constant 0 : index
    %29 = vector.load %arg7[%c0_14, %c0_15] : memref<8x1xf32, #tpu.memory_space<vmem>>, vector<8x1xf32>
    %30 = vector.broadcast %4 : vector<8x1xi32> to vector<8x128xi32>
    %31 = arith.cmpi eq, %8, %30 : vector<8x128xi32>
    %cst_16 = arith.constant 0.000000e+00 : f32
    %32 = vector.broadcast %cst_16 : f32 to vector<8x128xf32>
    %33 = arith.select %31, %3, %32 : vector<8x128xi1>, vector<8x128xf32>
    %cst_17 = arith.constant dense<0.000000e+00> : vector<8xf32>
    %34 = vector.multi_reduction <add>, %33, %cst_17 [1] : vector<8x128xf32> to vector<8xf32>
    %35 = vector.shape_cast %34 : vector<8xf32> to vector<8x1xf32>
    %36 = arith.addf %29, %35 : vector<8x1xf32>
    %c0_18 = arith.constant 0 : index
    %c0_19 = arith.constant 0 : index
    %37 = vector.load %arg7[%c0_18, %c0_19] : memref<8x1xf32, #tpu.memory_space<vmem>>, vector<8x1xf32>
    tpu.vector_store %arg7[%c0_18, %c0_19], %36 {strides = array<i32>} : memref<8x1xf32, #tpu.memory_space<vmem>>, vector<8x1xf32>,
    %c2_i32 = arith.constant 2 : i32
    %38 = arith.cmpi eq, %arg1, %c2_i32 : i32
    %39 = arith.extui %38 : i1 to i32
    %c0_i32_20 = arith.constant 0 : i32
    %40 = arith.cmpi ne, %39, %c0_i32_20 : i32
    scf.if %40 {
      %c0_21 = arith.constant 0 : index
      %c0_22 = arith.constant 0 : index
      %41 = vector.load %arg6[%c0_21, %c0_22] : memref<8x1xf32, #tpu.memory_space<vmem>>, vector<8x1xf32>
      %42 = math.log %41 : vector<8x1xf32>
      %c0_23 = arith.constant 0 : index
      %c0_24 = arith.constant 0 : index
      %43 = vector.load %arg5[%c0_23, %c0_24] : memref<8x1xf32, #tpu.memory_space<vmem>>, vector<8x1xf32>
      %44 = arith.addf %42, %43 : vector<8x1xf32>
      %c0_25 = arith.constant 0 : index
      %c0_26 = arith.constant 0 : index
      %45 = vector.load %arg7[%c0_25, %c0_26] : memref<8x1xf32, #tpu.memory_space<vmem>>, vector<8x1xf32>
      %46 = arith.subf %44, %45 : vector<8x1xf32>
      %47 = tpu.iota {dimensions = array<i32: 0>} : vector<8x1xi32>
      %c8_i32 = arith.constant 8 : i32
      %48 = arith.muli %arg0, %c8_i32 : i32
      %49 = vector.broadcast %48 : i32 to vector<8x1xi32>
      %50 = arith.addi %47, %49 : vector<8x1xi32>
      %c20_i32 = arith.constant 20 : i32
      %51 = vector.broadcast %c20_i32 : i32 to vector<8x1xi32>
      %52 = arith.cmpi slt, %50, %51 : vector<8x1xi32>
      %cst_27 = arith.constant 0.000000e+00 : f32
      %53 = vector.broadcast %cst_27 : f32 to vector<8x1xf32>
      %54 = arith.select %52, %46, %53 : vector<8x1xi1>, vector<8x1xf32>
      %c0_28 = arith.constant 0 : index
      %c0_29 = arith.constant 0 : index
      %55 = vector.load %arg4[%c0_28, %c0_29] : memref<8x1xf32, #tpu.memory_space<vmem>>, vector<8x1xf32>
      tpu.vector_store %arg4[%c0_28, %c0_29], %54 {strides = array<i32>} : memref<8x1xf32, #tpu.memory_space<vmem>>, vector<8x1xf32>,
    } else {
    }
    return
  }
  func.func @transform_0(%arg0: i32, %arg1: i32) -> (i32, i32) {
    %c0_i32 = arith.constant 0 : i32
    return %arg0, %arg1 : i32, i32
  }
  func.func @transform_1(%arg0: i32, %arg1: i32) -> (i32, i32) {
    %c0_i32 = arith.constant 0 : i32
    %c0_i32_0 = arith.constant 0 : i32
    return %arg0, %c0_i32 : i32, i32
  }
  func.func @transform_2(%arg0: i32, %arg1: i32) -> (i32, i32) {
    %c0_i32 = arith.constant 0 : i32
    %c0_i32_0 = arith.constant 0 : i32
    return %arg0, %c0_i32 : i32, i32
  }
}

</mosaic_0001>

<bundles_post_ra>
// kernel: tpu_custom_call.1
= control target key start
LH: loop header
LB: loop body
LE: loop exit
PB: predicated region body
PF: predicated region fallthrough
CT: control target
= control target key end

     0   :  { %7 = vsyncpa [#allocation6], 0  ;;  %s695_s0 = inlined_call_operand.hbm [shape: f32[20,300], index: 0, kind: input, shape index: {}]   ;;  %s696_s1 = inlined_call_operand.vmem [shape: s32[20,1], index: 1, kind: input, shape index: {}]   ;;  %s697_s2 = inlined_call_operand.vmem [shape: f32[24,1], index: 2, kind: output, shape index: {}]  }
   0x1   :  { %9 = vsyncpa [#allocation6 + $0x1], 0  ;;  %s568_s9 = smov 0   ;;  %s570_s10 = smov 0  }
   0x2   :  { %s572_s11 = smov 0   ;;  %s574_s12 = smov 0  }
   0x3   :  { %s576_s13 = smov 0   ;;  %s578_s14 = smov 0  }
   0x4   :  { %s580_s15 = smov 0   ;;  %s582_s16 = smov 0  }
   0x5 LB: > { %s353_s17 = sadd.s32 4294967295, %s548_s16   ;;  %s24_s18 = sadd.s32 1, %s540_s14  ;;  %s548_s16 = sphi %s582_s16, %s15_s16   ;;  %s544_s15 = sphi %s580_s15, %s706_s15   ;;  %s540_s14 = sphi %s578_s14, %s705_s14   ;;  %s536_s13 = sphi %s576_s13, %s704_s13   ;;  %s532_s12 = sphi %s574_s12, %s703_s12   ;;  %s528_s11 = sphi %s572_s11, %s702_s11   ;;  %s524_s10 = sphi %s570_s10, %s701_s10   ;;  %s520_s9 = sphi %s568_s9, %s700_s9  }
   0x6   : > { %p25_p0 = scmp.ge.s32.totalorder %s24_s18, 3  ;;  %s27_s19 = sadd.s32 1, %s544_s15 }
   0x7   : > { %s36_s20 = sadd.s32 1, %s528_s11  ;;  %p43_p1 = scmp.ne.s32.totalorder %s528_s11, %s524_s10 }
   0x8   : > { %s708_s18 = smov (%p25_p0, %s24_s18), 0  ;;  %s710_s19 = smov (!%p25_p0, %s27_s19), %s544_s15 }
   0x9   : > { %s32_s21 = ssub.s32 %s540_s14, %s708_s18  ;;  %p44_p2 = scmp.eq.s32.totalorder %s548_s16, 0 }
   0xa   : > { %p29_p3 = scmp.ge.s32.totalorder %s710_s19, 3  ;;  %p49_p4 = scmp.ne.s32.totalorder %s524_s10, %s520_s9 }
   0xb   : > { %p619_p5 = por %p44_p2, %p43_p1  ;;  %p50_p6 = scmp.eq.s32.totalorder %s353_s17, 0 }
   0xc   : > { %s712_s19 = smov (%p29_p3, %s710_s19), 0  ;;  %p376_p8 = scmp.lt.s32.totalorder %s548_s16, 9 }
   0xd   : > { %p625_p7 = por %p50_p6, %p49_p4  ;;  %s31_s24 = ssub.s32 %s544_s15, %s712_s19 }
   0xe   : > { %s33_s25 = sor.u32 %s32_s21, %s31_s24  ;;  %s125_s26 = sand.u32 1, %s528_s11  }
   0xf   : > { %p34_p9 = scmp.eq.s32.totalorder %s33_s25, 0  ;;  %s357_s27 = sshll.u32 %s125_s26, 3 }
  0x10   : > { %s369_s28 = smul.u32 3, %s544_s15  ;;  %s129_s4 = scalar_lea.vmem [#allocation5], %s357_s27 }
  0x11   : > { %s635_s29 = scalar_select %p34_p9, %s528_s11, %s36_s20  }
  0x12   : > { %s133_s30 = sadd.s32 %s540_s14, %s369_s28  ;;  %s139_s5 = sshll.u32 %s129_s4, 4  ;;  %s140_s5 = int_to_ptr.vmem [resolvable:$true] %s139_s5 }
  0x13   : > { %s358_s3 = sshll.u32 %s133_s30, 3  ;;  %p373_p10 = pnand %p376_p8, %p619_p5 }
  0x14   : > { %s135_s8 = scalar_lea.hbm %s695_s0, %s358_s3  ;;  %p359_p11 = scmp.ge.s32.totalorder %s548_s16, 1 }
  0x15   : > { %s137_s9 = sshll.u32 %s135_s8, 4  ;;  %p151_p12 = scmp.lt.s32.totalorder %s548_s16, 10  ;;  %s138_s9 = int_to_ptr.hbm [resolvable:$true] %s137_s9 }
  0x16   : > { %s126_s17 = scalar_lea.sflag [#allocation6], %s125_s26 }
  0x17   : > { %375 = dma.hbm_to_vmem [thread:$0]  (!%p373_p10), %s138_s9, 128, %s140_s5, %s126_s17  }
  0x18   : > { %p152_p13 = pnand %p359_p11, %p151_p12 }
  0x19   : > { %s157_s20 = sand.u32 (!%p152_p13), 1, %s524_s10  }
  0x1a   : > { %155 = sbr.rel (%p152_p13) target bundleno = 437 (0x1b5), region = 28  ;;  %s360_s21 = sshll.u32 (!%p152_p13), %s157_s20, 3 }
  0x1b   : > { %s158_s24 = scalar_lea.sflag (!%p152_p13), [#allocation6], %s157_s20  ;;  %s161_s25 = scalar_lea.vmem (!%p152_p13), [#allocation5], %s360_s21 }
  0x1f   : > { %515 = dma.done.wait (%p625_p7), %s158_s24, 128  }
  0x20   : > { %517 = vsyncadd (%p625_p7), %s158_s24, 4294967168  ;;  %p186_p0 = scmp.lt.s32.totalorder %s536_s13, 2  ;;  %p363_p1 = scmp.ne.s32.totalorder %s532_s12, 0 }
  0x22   : > { %s187_s22 = scalar_select %p186_p0, %s536_s13, 2 }
  0x23   : > { %197 = sbr.rel (%p363_p1) target bundleno = 44 (0x2c), region = 36 }
  0x24   : > { %s361_s27 = sshll.u32 %s187_s22, 3 }
  0x25   : > { %s189_s30 = scalar_lea.vmem %s696_s1, %s361_s27  ;;  %s660_s5 = scalar_lea.vmem %s697_s2, %s361_s27 }
  0x28   : > { %vm198_vm0 = vcmask 7168   ;;  %v550_v0 = vmov -1e+30   ;;  %v551_v1 = vmov 0.0  }
  0x29   : > { %199 = vst.msk [vmem:[#allocation2] sm:$0xff] %vm198_vm0, %v550_v0 }
  0x2a   : > { %200 = vst.msk [vmem:[#allocation3] sm:$0xff] %vm198_vm0, %v551_v1 }
  0x2b   : > { %201 = vst.msk [vmem:[#allocation4] sm:$0xff] %vm198_vm0, %v551_v1 }
  0x2c PF: > { %v204_v2 = vlaneseq  ;;  %s364_s23 = sshll.u32 %s532_s12, 7  ;;  %v202_v5 = vld [vmem:[%s161_s25] sm:$0xff]  ;;  %v552_v8 = vmov 0   ;;  %vm231_vm2 = vcmask 7168   ;;  %p365_p2 = scmp.ne.s32.totalorder %s532_s12, 2 }
  0x2d   : > { %v207_v3 = vstv %s364_s23  ;;  %444 = vset.pattern.permute.xlu0 %v552_v8  ;;  %445 = vset.pattern.permute.xlu1 %v552_v8  ;;  %v203_v9 = vld [vmem:[%s189_s30] sm:$0xff]  ;;  %s366_s6 = sshll.u32 (!%p365_p2), %s536_s13, 3 }
  0x2e   : > { %v205_v4 = vand.u32 127, %v204_v2  ;;  %236 = vperm.xlu1 %445, %v203_v9  }
  0x30   : > { %v208_v6 = vadd.s32 %v207_v3, %v205_v4  ;;  %v211_v10 = vld [vmem:[#allocation2] sm:$0xff] }
  0x31   : > { %v218_v25 = vld [vmem:[#allocation3] sm:$0xff] }
  0x32   : > { %vm209_vm1 = vcmp.lt.s32.totalorder %v208_v6, 300  ;;  %v234_v20 = vld [vmem:[#allocation4] sm:$0xff] }
  0x33   : > { %v210_v7 = vsel %vm209_vm1, %v202_v5, -1e+30 }
  0x34   : > { %212 = vmax.xlane.f32.xlu0 %v210_v7 }
  0xa0   : > { %v237_v14 = vpop.permute.xlu1 %236 }
  0xa1   : > { %vm238_vm3 = vcmp.eq.s32.totalorder %v208_v6, %v237_v14 }
  0xa2   : > { %v239_v15 = vsel %vm238_vm3, %v202_v5, 0.0 }
  0xa3   : > { %240 = vadd.xlane.f32.xlu2 %v239_v15 }
  0xa7   : > { %v213_v11 = vpop.xlane.xlu0 %212 }
  0xa8   : > { %v214_v12 = vmax.f32 %v211_v10, %v213_v11 }
  0xaa   : > { %v215_v13 = vsub.f32 %v211_v10, %v214_v12  ;;  %233 = vst.msk [vmem:[#allocation2] sm:$0xff] %vm231_vm2, %v214_v12  ;;  %222 = vperm.xlu0 %444, %v214_v12  }
  0xac   : > { %v216_v23 = vmul.f32 1.442695, %v215_v13 }
 0x116   : > { %v241_v21 = vpop.xlane.xlu2 %240 }
 0x117   : > { %v242_v22 = vadd.f32 %v241_v21, %v234_v20 }
 0x119   : > { %243 = vst.msk [vmem:[#allocation4] sm:$0xff] %vm231_vm2, %v242_v22 }
 0x11c   : > { %v223_v16 = vpop.permute.xlu0 %222 }
 0x11d   : > { %v225_v17 = vsub.f32 %v210_v7, %v223_v16 }
 0x11f   : > { %v226_v18 = vmul.f32 1.442695, %v225_v17 }
 0x121   : > { %446 = vpow2.f32 %v226_v18 }
 0x122   : > { %448 = vpow2.f32 %v216_v23 }
 0x127   : > { %v447_v19 = vpop.eup %446 }
 0x128   : > { %228 = vadd.xlane.f32.xlu1 %v447_v19  ;;  %v449_v24 = vpop.eup %448 }
 0x129   : > { %v219_v26 = vmul.f32 %v449_v24, %v218_v25 }
 0x19a   : > { %247 = sbr.rel (%p365_p2) target bundleno = 437 (0x1b5), region = 40 }
 0x19b   : > { %v229_v27 = vpop.xlane.xlu1 %228 }
 0x19c   : > { %v230_v28 = vadd.f32 %v229_v27, %v219_v26 }
 0x19e   : > { %232 = vst.msk [vmem:[#allocation3] sm:$0xff] %vm231_vm2, %v230_v28 }
 0x19f   : > { %v256_v30 = vshrl.u32 %v204_v2, 7  ;;  %v258_v31 = vstv %s366_s6  ;;  %v251_v33 = vld [vmem:[#allocation2] sm:$0xff]  ;;  %v253_v36 = vld [vmem:[#allocation4] sm:$0xff] }
 0x1a1   : > { %v259_v34 = vadd.s32 %v258_v31, %v256_v30 }
 0x1a3   : > { %vm260_vm4 = vcmp.lt.s32.totalorder %v259_v34, 20 }
 0x1a5   : > { %v248_v29 = vld [vmem:[#allocation3] sm:$0xff] }
 0x1a6   : > { %450 = vlog2.f32 %v248_v29 }
 0x1ac   : > { %v451_v32 = vpop.eup %450 }
 0x1ad   : > { %v250_v35 = vmul.f32 0.6931472, %v451_v32 }
 0x1af   : > { %v252_v37 = vadd.f32 %v251_v33, %v250_v35 }
 0x1b1   : > { %v254_v38 = vsub.f32 %v252_v37, %v253_v36 }
 0x1b3   : > { %v261_v39 = vsel %vm260_vm4, %v254_v38, 0.0 }
 0x1b4   : > { %262 = vst.msk [vmem:[%s660_s5] sm:$0xff] %vm231_vm2, %v261_v39 }
 0x1b5 PF: > { %s15_s16 = sadd.s32 1, %s548_s16   ;;  %s700_s9 = smov %s524_s10 }
 0x1b6   : > { %p12_p3 = scmp.ge.s32.totalorder %s15_s16, 11   ;;  %s701_s10 = smov %s528_s11 }
 0x1b7   : > { %s702_s11 = smov %s635_s29  ;;  %s703_s12 = smov %s540_s14 }
 0x1b8   : > { %s704_s13 = smov %s544_s15  ;;  %s705_s14 = smov %s708_s18 }
 0x1b9   : > { %s706_s15 = smov %s712_s19  ;;  %14 = sbr.rel (!%p12_p3) target bundleno = 5 (0x5), region = 79 }
 0x1be   :  { %282 = vsyncpa [#allocation6], 1 }
 0x1bf   :  { %284 = vsyncpa [#allocation6 + $0x1], 1 }

</bundles_post_ra>
